<compile_context>
chip_gen: v5e
topology: v5e:2x2
jax: 0.10.0
libtpu: 0.0.40
codegen_flags: <defaults>
</compile_context>

<pallas_src>
import numpy as np
import jax
import jax.numpy as jnp
from jax import lax
from jax.experimental import pallas as pl
from jax.experimental.pallas import tpu as pltpu

# ---------------- problem sizes (small, synthetic) ----------------
B, C, H, W = 2, 4, 16, 16
PATCH = 4                      # synthetic encoder: 4x4 / stride-4 conv + ReLU
HF, WF = H // PATCH, W // PATCH
S = HF * WF                    # flattened penultimate spatial size
K = C * PATCH * PATCH          # im2col patch length
CF = 32                        # penultimate feature channels
D = 16                         # projector output dim
EPS = 1e-20


# ---------------- the single fused kernel ----------------
def _gradcam_fused_kernel(patches_ref, wc_ref, bc_ref, wp_ref, bp_ref,
                          pool_ref, ne_ref, sel_ref, uk_ref, out_ref):
    """encoder conv + projection + contrastive-score grad + CAM + bicubic upsample +
    per-sample normalize; everything 2-D and VMEM-resident.

    patches_ref: (B*S, K)   wc_ref: (K, CF)   bc_ref: (1, CF)
    wp_ref:      (CF, D)    bp_ref: (1, D)
    pool_ref:    (B, B*S)   block-diagonal / S (avg-pool matrix; reused as CAM gate)
    ne_ref:      (B, B)     1 - eye
    sel_ref:     (B*S, S)   column selector: sel[b*S+s, s] = 1
    uk_ref:      (S, H*W)   kron(uh, uw)^T bicubic matrix, shared by all samples
    out_ref:     (B, H*W)   lane-dense; reshaped to (B, 1, H, W) in the wrapper
    """
    f32 = jnp.float32

    # --- encoder: patchify conv as one MXU matmul + ReLU (batch folded into sublanes) ---
    feat = jnp.maximum(
        jnp.dot(patches_ref[...], wc_ref[...], preferred_element_type=f32)
        + bc_ref[...], 0.0)                                                   # (B*S, CF)

    # --- adaptive avg-pool per sample: one MXU matmul with the precomputed pool matrix ---
    pooled = jnp.dot(pool_ref[...], feat, preferred_element_type=f32)         # (B, CF)

    # --- projector Linear ---
    q = jnp.dot(pooled, wp_ref[...], preferred_element_type=f32) + bp_ref[...]  # (B, D)

    # --- _contrastive_score grad (n_iters=1: key == queues[0] == stop_gradient(q)) ---
    not_eye = ne_ref[...]                                                     # (B, B)
    pos = jnp.sum(q * q, axis=1, keepdims=True)                               # (B, 1)
    gram = lax.dot_general(q, q, (((1,), (1,)), ((), ())),
                           preferred_element_type=f32) * not_eye              # (B, B), zero diag
    # shift-invariant stabilization (exact): diag of gram is 0 so the row max is >= 0,
    # which also covers the exp(0)=1 diagonal terms that must appear in s_neg.
    m_pos = jnp.max(pos, axis=0, keepdims=True)                               # (1, 1)
    m_neg = jnp.max(gram, axis=1, keepdims=True)                              # (B, 1)
    exp_pos = jnp.exp(pos - m_pos)                                            # (B, 1)
    exp_neg = jnp.exp(gram - m_neg)                                           # (B, B)
    inv_s_pos = pl.reciprocal(jnp.sum(exp_pos, axis=0, keepdims=True), approx=True)  # (1, 1)
    inv_s_neg = pl.reciprocal(jnp.sum(exp_neg, axis=1, keepdims=True), approx=True)  # (B, 1)

    # --- analytic d score.sum() / d q (key / queue entries are detached) ---
    coef_pos = (float(B) * exp_pos) * inv_s_pos                               # (B, 1)
    w_neg = (exp_neg * not_eye) * inv_s_neg                                   # (B, B)
    g_out = coef_pos * q - jnp.dot(w_neg, q, preferred_element_type=f32)      # (B, D)

    # --- backprop through Linear + adaptive avg-pool; clamp_negative_weights ---
    g_pooled = lax.dot_general(g_out, wp_ref[...], (((1,), (1,)), ((), ())),
                               preferred_element_type=f32)                    # (B, CF)
    # NOTE: the avg-pool 1/S factor is intentionally dropped: ReLU and the per-sample
    # min/max normalization are invariant to a uniform positive scale.  Only valid for
    # this n_iters=1 contrastive path.
    weight = jnp.maximum(g_pooled, 0.0)                                       # (B, CF)

    # --- cam[b, s] = relu(weight[b] . feat[b*S+s]) : MXU matmul, block-diag gate,
    #     then block-selection matmul down to a true per-sample (B, S) block ---
    cam_all = lax.dot_general(weight, feat, (((1,), (1,)), ((), ())),
                              preferred_element_type=f32)                     # (B, B*S)
    cam_gated = jnp.maximum(cam_all, 0.0) * pool_ref[...]   # off-block -> 0; 1/S scale cancels
    cam = jnp.dot(cam_gated, sel_ref[...], preferred_element_type=f32)        # (B, S)

    # --- bicubic upsample with the shared (non-tiled) Kronecker matrix ---
    up = jnp.dot(cam, uk_ref[...], preferred_element_type=f32)                # (B, H*W)

    # --- per-sample normalize: independent min/max reduces + EUP reciprocal ---
    rmin = jnp.min(up, axis=1, keepdims=True)
    rmax = jnp.max(up, axis=1, keepdims=True)
    out_ref[...] = (up - rmin) * pl.reciprocal(rmax - rmin + EPS, approx=True)


# ---------------- glue: PyTorch-exact bicubic interpolation matrices ----------------
def _bicubic_matrix(out_size, in_size, a=-0.75):
    """F.interpolate(mode='bicubic', align_corners=False) as a dense (out, in) matrix."""
    def cc1(t):   # |t| <= 1
        return ((a + 2.0) * t - (a + 3.0)) * t * t + 1.0

    def cc2(t):   # 1 < |t| < 2
        return ((a * t - 5.0 * a) * t + 8.0 * a) * t - 4.0 * a

    m = np.zeros((out_size, in_size), np.float32)
    scale = in_size / out_size
    for i in range(out_size):
        x = (i + 0.5) * scale - 0.5
        x0 = int(np.floor(x))
        t = x - x0
        ws = (cc2(t + 1.0), cc1(t), cc1(1.0 - t), cc2(2.0 - t))
        for k2, wgt in enumerate(ws):
            idx = min(max(x0 - 1 + k2, 0), in_size - 1)                       # border clamp
            m[i, idx] += wgt
    return m


# ---------------- wrapper: GradCAM.forward(image, score_type='con', n_iters=1) ----------------
def gradcam_forward(image, w_conv, b_conv, w_proj, b_proj, pool_mat, not_eye, sel, u_kron):
    bsz = image.shape[0]
    # n_iters == 1: mask_color (image.mean over (0,2,3)) only repaints the image for later
    # iterations and never affects the returned mask, so it is intentionally not computed.

    # im2col for the synthetic 4x4/stride-4 patchify conv; batch folded into rows so the
    # whole batch is one (B*S, K) LHS for a single MXU matmul.  Under jit this is one small
    # fused transpose feeding the pallas_call input.
    # TODO(synk): fold the im2col / channels-last transform into the kernel (strided DMA)
    #             once many samples are batched per call; at (2,4,16,16) it is noise.
    patches = image.reshape(bsz, C, HF, PATCH, WF, PATCH)
    patches = patches.transpose(0, 2, 4, 1, 3, 5).reshape(bsz * S, K)
    w_mat = w_conv.reshape(CF, K).T                                           # (K, CF)

    # advisory (accurate, tiny) cost so XLA schedules/overlaps the custom call aggressively
    flops = 2 * (bsz * S * K * CF            # encoder matmul
                 + bsz * (bsz * S) * CF      # avg-pool matmul
                 + bsz * CF * D              # projector
                 + 2 * bsz * bsz * D         # gram + w_neg @ q
                 + bsz * D * CF              # grad w.r.t. pooled
                 + bsz * (bsz * S) * CF      # cam_all
                 + bsz * (bsz * S) * S       # block selection
                 + bsz * S * H * W)          # bicubic upsample
    transcendentals = bsz + bsz * bsz + 1 + 2 * bsz       # exps + reciprocals
    in_arrays = (patches, w_mat, b_conv, w_proj, b_proj, pool_mat, not_eye, sel, u_kron)
    bytes_accessed = 4 * (sum(int(np.prod(a.shape)) for a in in_arrays) + bsz * H * W)

    cam_flat = pl.pallas_call(
        _gradcam_fused_kernel,
        out_shape=jax.ShapeDtypeStruct((bsz, H * W), jnp.float32),            # lane-dense (2, 256)
        in_specs=[pl.BlockSpec(memory_space=pltpu.MemorySpace.VMEM)] * len(in_arrays),
        out_specs=pl.BlockSpec(memory_space=pltpu.MemorySpace.VMEM),
        cost_estimate=pl.CostEstimate(flops=flops,
                                      transcendentals=transcendentals,
                                      bytes_accessed=bytes_accessed),
    )(*in_arrays)

    return cam_flat.reshape(bsz, 1, H, W)                                     # NCHW, PyTorch layout


# ---------------- pure-JAX reference (uses jax.grad + separable bicubic) ----------------
def _reference(image, w_conv, b_conv, w_proj, b_proj, uh, uw):
    bsz = image.shape[0]
    patches = image.reshape(bsz, C, HF, PATCH, WF, PATCH)
    patches = patches.transpose(0, 2, 4, 1, 3, 5).reshape(bsz, S, K)
    feat = jnp.maximum(patches @ w_conv.reshape(CF, K).T + b_conv, 0.0).reshape(bsz, HF, WF, CF)

    def score_sum(f):
        pooled = f.mean(axis=(1, 2))
        out = pooled @ w_proj + b_proj
        q, kk = out, lax.stop_gradient(out)
        eye = jnp.eye(bsz, dtype=out.dtype)
        pos = jnp.sum(q * kk, axis=1)
        neg = (q @ kk.T) * (1.0 - eye)
        score = jnp.log(jnp.sum(jnp.exp(pos)) / jnp.sum(jnp.exp(neg), axis=1))
        return score.sum()

    grad = jax.grad(score_sum)(feat)
    weight = jnp.maximum(grad.mean(axis=(1, 2)), 0.0)
    cam = jnp.maximum(jnp.einsum('bc,bhwc->bhw', weight, feat), 0.0)
    up = jnp.einsum('ab,nbc->nac', uh, cam)
    up = jnp.einsum('nac,dc->nad', up, uw)
    up = up - up.min(axis=(1, 2), keepdims=True)
    up = up / (up.max(axis=(1, 2), keepdims=True) + EPS)
    return up[:, None]


if __name__ == "__main__":
    key = jax.random.PRNGKey(0)
    k_img, k_wc, k_bc, k_wp, k_bp = jax.random.split(key, 5)

    image = jax.random.normal(k_img, (B, C, H, W), jnp.float32)               # NCHW, PyTorch convention
    # deterministic synthetic parameters (encoder conv + projector Linear)
    w_conv = jax.random.normal(k_wc, (CF, C, PATCH, PATCH), jnp.float32) / np.sqrt(K)
    b_conv = jax.random.normal(k_bc, (1, CF), jnp.float32) * 0.1
    w_proj = jax.random.normal(k_wp, (CF, D), jnp.float32) / np.sqrt(CF)
    b_proj = jax.random.normal(k_bp, (1, D), jnp.float32) * 0.1

    # --- precomputed, data-independent f32 constant matrices (built once, host-side) ---
    pool_mat = jnp.asarray(np.kron(np.eye(B, dtype=np.float32),
                                   np.full((1, S), 1.0 / S, np.float32)))     # (B, B*S)
    not_eye = jnp.asarray(1.0 - np.eye(B, dtype=np.float32))                  # (B, B)
    sel = jnp.asarray(np.tile(np.eye(S, dtype=np.float32), (B, 1)))           # (B*S, S)
    uh_np = _bicubic_matrix(H, HF)                                            # (H, HF)
    uw_np = _bicubic_matrix(W, WF)                                            # (W, WF)
    u_kron = jnp.asarray(np.ascontiguousarray(np.kron(uh_np, uw_np).T))       # (S, H*W) shared

    cam = jax.jit(gradcam_forward)(image, w_conv, b_conv, w_proj, b_proj,
                                   pool_mat, not_eye, sel, u_kron)
    cam = jax.block_until_ready(cam)

    ref = _reference(image, w_conv, b_conv, w_proj, b_proj,
                     jnp.asarray(uh_np), jnp.asarray(uw_np))
    assert cam.shape == (B, 1, H, W)
    assert bool(jnp.all(jnp.isfinite(cam)))
    assert bool(jnp.allclose(cam, ref, atol=1e-2, rtol=1e-2)), "mismatch vs pure-JAX reference"
    print("KERNEL_OK")
</pallas_src>

<mosaic_0001>
module attributes {stable_mosaic.version = 11 : i64} {
  func.func @_gradcam_fused_kernel(%arg0: memref<32x64xf32, #tpu.memory_space<vmem>>, %arg1: memref<64x32xf32, #tpu.memory_space<vmem>>, %arg2: memref<1x32xf32, #tpu.memory_space<vmem>>, %arg3: memref<32x16xf32, #tpu.memory_space<vmem>>, %arg4: memref<1x16xf32, #tpu.memory_space<vmem>>, %arg5: memref<2x32xf32, #tpu.memory_space<vmem>>, %arg6: memref<2x2xf32, #tpu.memory_space<vmem>>, %arg7: memref<32x16xf32, #tpu.memory_space<vmem>>, %arg8: memref<16x256xf32, #tpu.memory_space<vmem>>, %arg9: memref<2x256xf32, #tpu.memory_space<vmem>>) attributes {dimension_semantics = [], scalar_prefetch = 0 : i64, scratch_operands = 0 : i64, tpu.core_type = #tpu.core_type<tc>} {
    %c0 = arith.constant 0 : index
    %c0_0 = arith.constant 0 : index
    %0 = vector.load %arg0[%c0, %c0_0] : memref<32x64xf32, #tpu.memory_space<vmem>>, vector<32x64xf32>
    %c0_1 = arith.constant 0 : index
    %c0_2 = arith.constant 0 : index
    %1 = vector.load %arg1[%c0_1, %c0_2] : memref<64x32xf32, #tpu.memory_space<vmem>>, vector<64x32xf32>
    %cst = arith.constant dense<0.000000e+00> : vector<32x32xf32>
    %2 = tpu.matmul %0, %1, %cst {dimension_numbers = #tpu.dot_dimension_numbers<[1], [0], [0], [1], [0, 0, 1, 1], [], []>} : vector<32x64xf32>, vector<64x32xf32>, vector<32x32xf32> -> vector<32x32xf32>
    %c0_3 = arith.constant 0 : index
    %c0_4 = arith.constant 0 : index
    %3 = vector.load %arg2[%c0_3, %c0_4] : memref<1x32xf32, #tpu.memory_space<vmem>>, vector<1x32xf32>
    %4 = vector.broadcast %3 : vector<1x32xf32> to vector<32x32xf32>
    %5 = arith.addf %2, %4 : vector<32x32xf32>
    %cst_5 = arith.constant 0.000000e+00 : f32
    %6 = vector.broadcast %cst_5 : f32 to vector<32x32xf32>
    %7 = arith.maximumf %5, %6 : vector<32x32xf32>
    %c0_6 = arith.constant 0 : index
    %c0_7 = arith.constant 0 : index
    %8 = vector.load %arg5[%c0_6, %c0_7] : memref<2x32xf32, #tpu.memory_space<vmem>>, vector<2x32xf32>
    %cst_8 = arith.constant dense<0.000000e+00> : vector<2x32xf32>
    %9 = tpu.matmul %8, %7, %cst_8 {dimension_numbers = #tpu.dot_dimension_numbers<[1], [0], [0], [1], [0, 0, 1, 1], [], []>} : vector<2x32xf32>, vector<32x32xf32>, vector<2x32xf32> -> vector<2x32xf32>
    %c0_9 = arith.constant 0 : index
    %c0_10 = arith.constant 0 : index
    %10 = vector.load %arg3[%c0_9, %c0_10] : memref<32x16xf32, #tpu.memory_space<vmem>>, vector<32x16xf32>
    %cst_11 = arith.constant dense<0.000000e+00> : vector<2x16xf32>
    %11 = tpu.matmul %9, %10, %cst_11 {dimension_numbers = #tpu.dot_dimension_numbers<[1], [0], [0], [1], [0, 0, 1, 1], [], []>} : vector<2x32xf32>, vector<32x16xf32>, vector<2x16xf32> -> vector<2x16xf32>
    %c0_12 = arith.constant 0 : index
    %c0_13 = arith.constant 0 : index
    %12 = vector.load %arg4[%c0_12, %c0_13] : memref<1x16xf32, #tpu.memory_space<vmem>>, vector<1x16xf32>
    %13 = vector.broadcast %12 : vector<1x16xf32> to vector<2x16xf32>
    %14 = arith.addf %11, %13 : vector<2x16xf32>
    %c0_14 = arith.constant 0 : index
    %c0_15 = arith.constant 0 : index
    %15 = vector.load %arg6[%c0_14, %c0_15] : memref<2x2xf32, #tpu.memory_space<vmem>>, vector<2x2xf32>
    %16 = arith.mulf %14, %14 : vector<2x16xf32>
    %cst_16 = arith.constant dense<0.000000e+00> : vector<2xf32>
    %17 = vector.multi_reduction <add>, %16, %cst_16 [1] : vector<2x16xf32> to vector<2xf32>
    %18 = vector.shape_cast %17 : vector<2xf32> to vector<2x1xf32>
    %cst_17 = arith.constant dense<0.000000e+00> : vector<2x2xf32>
    %19 = tpu.matmul %14, %14, %cst_17 {dimension_numbers = #tpu.dot_dimension_numbers<[1], [1], [0], [0], [0, 0, 1, 0], [], []>} : vector<2x16xf32>, vector<2x16xf32>, vector<2x2xf32> -> vector<2x2xf32>
    %20 = arith.mulf %19, %15 : vector<2x2xf32>
    %cst_18 = arith.constant dense<0xFF800000> : vector<1xf32>
    %21 = vector.multi_reduction <maximumf>, %18, %cst_18 [0] : vector<2x1xf32> to vector<1xf32>
    %22 = vector.shape_cast %21 : vector<1xf32> to vector<1x1xf32>
    %cst_19 = arith.constant dense<0xFF800000> : vector<2xf32>
    %23 = vector.multi_reduction <maximumf>, %20, %cst_19 [1] : vector<2x2xf32> to vector<2xf32>
    %24 = vector.shape_cast %23 : vector<2xf32> to vector<2x1xf32>
    %25 = vector.broadcast %22 : vector<1x1xf32> to vector<2x1xf32>
    %26 = arith.subf %18, %25 : vector<2x1xf32>
    %27 = math.exp %26 : vector<2x1xf32>
    %28 = vector.broadcast %24 : vector<2x1xf32> to vector<2x2xf32>
    %29 = arith.subf %20, %28 : vector<2x2xf32>
    %30 = math.exp %29 : vector<2x2xf32>
    %cst_20 = arith.constant dense<0.000000e+00> : vector<1xf32>
    %31 = vector.multi_reduction <add>, %27, %cst_20 [0] : vector<2x1xf32> to vector<1xf32>
    %32 = vector.shape_cast %31 : vector<1xf32> to vector<1x1xf32>
    %33 = tpu.reciprocal %32 {approx = true} : vector<1x1xf32> -> vector<1x1xf32>
    %cst_21 = arith.constant dense<0.000000e+00> : vector<2xf32>
    %34 = vector.multi_reduction <add>, %30, %cst_21 [1] : vector<2x2xf32> to vector<2xf32>
    %35 = vector.shape_cast %34 : vector<2xf32> to vector<2x1xf32>
    %36 = tpu.reciprocal %35 {approx = true} : vector<2x1xf32> -> vector<2x1xf32>
    %cst_22 = arith.constant 2.000000e+00 : f32
    %37 = vector.broadcast %cst_22 : f32 to vector<2x1xf32>
    %38 = arith.mulf %37, %27 : vector<2x1xf32>
    %39 = vector.broadcast %33 : vector<1x1xf32> to vector<2x1xf32>
    %40 = arith.mulf %38, %39 : vector<2x1xf32>
    %41 = arith.mulf %30, %15 : vector<2x2xf32>
    %42 = vector.broadcast %36 : vector<2x1xf32> to vector<2x2xf32>
    %43 = arith.mulf %41, %42 : vector<2x2xf32>
    %44 = vector.broadcast %40 : vector<2x1xf32> to vector<2x16xf32>
    %45 = arith.mulf %44, %14 : vector<2x16xf32>
    %cst_23 = arith.constant dense<0.000000e+00> : vector<2x16xf32>
    %46 = tpu.matmul %43, %14, %cst_23 {dimension_numbers = #tpu.dot_dimension_numbers<[1], [0], [0], [1], [0, 0, 1, 1], [], []>} : vector<2x2xf32>, vector<2x16xf32>, vector<2x16xf32> -> vector<2x16xf32>
    %47 = arith.subf %45, %46 : vector<2x16xf32>
    %c0_24 = arith.constant 0 : index
    %c0_25 = arith.constant 0 : index
    %48 = vector.load %arg3[%c0_24, %c0_25] : memref<32x16xf32, #tpu.memory_space<vmem>>, vector<32x16xf32>
    %cst_26 = arith.constant dense<0.000000e+00> : vector<2x32xf32>
    %49 = tpu.matmul %47, %48, %cst_26 {dimension_numbers = #tpu.dot_dimension_numbers<[1], [1], [0], [0], [0, 0, 1, 0], [], []>} : vector<2x16xf32>, vector<32x16xf32>, vector<2x32xf32> -> vector<2x32xf32>
    %cst_27 = arith.constant 0.000000e+00 : f32
    %50 = vector.broadcast %cst_27 : f32 to vector<2x32xf32>
    %51 = arith.maximumf %49, %50 : vector<2x32xf32>
    %cst_28 = arith.constant dense<0.000000e+00> : vector<2x32xf32>
    %52 = tpu.matmul %51, %7, %cst_28 {dimension_numbers = #tpu.dot_dimension_numbers<[1], [1], [0], [0], [0, 0, 1, 0], [], []>} : vector<2x32xf32>, vector<32x32xf32>, vector<2x32xf32> -> vector<2x32xf32>
    %cst_29 = arith.constant 0.000000e+00 : f32
    %53 = vector.broadcast %cst_29 : f32 to vector<2x32xf32>
    %54 = arith.maximumf %52, %53 : vector<2x32xf32>
    %c0_30 = arith.constant 0 : index
    %c0_31 = arith.constant 0 : index
    %55 = vector.load %arg5[%c0_30, %c0_31] : memref<2x32xf32, #tpu.memory_space<vmem>>, vector<2x32xf32>
    %56 = arith.mulf %54, %55 : vector<2x32xf32>
    %c0_32 = arith.constant 0 : index
    %c0_33 = arith.constant 0 : index
    %57 = vector.load %arg7[%c0_32, %c0_33] : memref<32x16xf32, #tpu.memory_space<vmem>>, vector<32x16xf32>
    %cst_34 = arith.constant dense<0.000000e+00> : vector<2x16xf32>
    %58 = tpu.matmul %56, %57, %cst_34 {dimension_numbers = #tpu.dot_dimension_numbers<[1], [0], [0], [1], [0, 0, 1, 1], [], []>} : vector<2x32xf32>, vector<32x16xf32>, vector<2x16xf32> -> vector<2x16xf32>
    %c0_35 = arith.constant 0 : index
    %c0_36 = arith.constant 0 : index
    %59 = vector.load %arg8[%c0_35, %c0_36] : memref<16x256xf32, #tpu.memory_space<vmem>>, vector<16x256xf32>
    %cst_37 = arith.constant dense<0.000000e+00> : vector<2x256xf32>
    %60 = tpu.matmul %58, %59, %cst_37 {dimension_numbers = #tpu.dot_dimension_numbers<[1], [0], [0], [1], [0, 0, 1, 1], [], []>} : vector<2x16xf32>, vector<16x256xf32>, vector<2x256xf32> -> vector<2x256xf32>
    %cst_38 = arith.constant dense<0x7F800000> : vector<2xf32>
    %61 = vector.multi_reduction <minimumf>, %60, %cst_38 [1] : vector<2x256xf32> to vector<2xf32>
    %62 = vector.shape_cast %61 : vector<2xf32> to vector<2x1xf32>
    %cst_39 = arith.constant dense<0xFF800000> : vector<2xf32>
    %63 = vector.multi_reduction <maximumf>, %60, %cst_39 [1] : vector<2x256xf32> to vector<2xf32>
    %64 = vector.shape_cast %63 : vector<2xf32> to vector<2x1xf32>
    %65 = vector.broadcast %62 : vector<2x1xf32> to vector<2x256xf32>
    %66 = arith.subf %60, %65 : vector<2x256xf32>
    %67 = arith.subf %64, %62 : vector<2x1xf32>
    %cst_40 = arith.constant 9.99999968E-21 : f32
    %68 = vector.broadcast %cst_40 : f32 to vector<2x1xf32>
    %69 = arith.addf %67, %68 : vector<2x1xf32>
    %70 = tpu.reciprocal %69 {approx = true} : vector<2x1xf32> -> vector<2x1xf32>
    %71 = vector.broadcast %70 : vector<2x1xf32> to vector<2x256xf32>
    %72 = arith.mulf %66, %71 : vector<2x256xf32>
    %c0_41 = arith.constant 0 : index
    %c0_42 = arith.constant 0 : index
    %73 = vector.load %arg9[%c0_41, %c0_42] : memref<2x256xf32, #tpu.memory_space<vmem>>, vector<2x256xf32>
    tpu.vector_store %arg9[%c0_41, %c0_42], %72 {strides = array<i32>} : memref<2x256xf32, #tpu.memory_space<vmem>>, vector<2x256xf32>,
    return
  }
}

</mosaic_0001>

<bundles_post_ra>
// kernel: gradcam_forward.1
= control target key start
LH: loop header
LB: loop body
LE: loop exit
PB: predicated region body
PF: predicated region fallthrough
CT: control target
= control target key end

     0   :  { %vm48_vm0 = vcmask 523264   ;;  %vm95_vm1 = vcmask 261120   ;;  %vm156_vm2 = vcmask 130048   ;;  %vm181_vm3 = vcmask 1041408   ;;  %s618_s1 = inlined_call_operand.vmem [shape: f32[64,32], index: 1, kind: input, shape index: {}]   ;;  %s619_s2 = inlined_call_operand.vmem [shape: f32[1,32], index: 2, kind: input, shape index: {}]   ;;  %s620_s0 = inlined_call_operand.vmem [shape: f32[32,64], index: 0, kind: input, shape index: {}]   ;;  %s621_s3 = inlined_call_operand.vmem [shape: f32[32,16], index: 3, kind: input, shape index: {}]   ;;  %s622_s5 = inlined_call_operand.vmem [shape: f32[2,32], index: 5, kind: input, shape index: {}]   ;;  %s623_s4 = inlined_call_operand.vmem [shape: f32[1,16], index: 4, kind: input, shape index: {}]   ;;  %s624_s6 = inlined_call_operand.vmem [shape: f32[2,2], index: 6, kind: input, shape index: {}]   ;;  %s625_s7 = inlined_call_operand.vmem [shape: f32[32,16], index: 7, kind: input, shape index: {}]   ;;  %s626_s8 = inlined_call_operand.vmem [shape: f32[16,256], index: 8, kind: input, shape index: {}]   ;;  %s627_s9 = inlined_call_operand.vmem [shape: f32[2,256], index: 9, kind: output, shape index: {}]  }
   0x1   :  { %v43_v0 = vld [vmem:[%s618_s1 + $0x38] sm:$0xff]  ;;  %v42_v1 = vld [vmem:[%s618_s1 + $0x30] sm:$0xff]  ;;  %v41_v2 = vld [vmem:[%s618_s1 + $0x28] sm:$0xff]  ;;  %vm152_vm4 = vcmask 123904   ;;  %vm189_vm5 = vcmask 9216   ;;  %vm216_vm6 = vcmask 15360  }
   0x2   :  { %69 = vmatpush.msra.mxu0 %v43_v0  ;;  %v40_v3 = vld [vmem:[%s618_s1 + $0x20] sm:$0xff]  ;;  %v39_v4 = vld [vmem:[%s618_s1 + $0x18] sm:$0xff]  ;;  %v38_v5 = vld [vmem:[%s618_s1 + $0x10] sm:$0xff] }
   0x3   :  { %v37_v6 = vld [vmem:[%s618_s1 + $0x8] sm:$0xff]  ;;  %v36_v7 = vld [vmem:[%s618_s1] sm:$0xff]  ;;  %v34_v10 = vld [vmem:[%s620_s0 + $0x10] sm:$0xff] }
   0x4   :  { %70 = vmatpush.msra.mxu0 %v42_v1  ;;  %v32_v8 = vld [vmem:[%s620_s0] sm:$0xff]  ;;  %v33_v9 = vld [vmem:[%s620_s0 + $0x8] sm:$0xff]  ;;  %v35_v11 = vld [vmem:[%s620_s0 + $0x18] sm:$0xff] }
   0x5   :  { %v122_v12 = vld [vmem:[%s621_s3 + $0x18] sm:$0xff]  ;;  %v121_v13 = vld [vmem:[%s621_s3 + $0x10] sm:$0xff]  ;;  %v120_v14 = vld [vmem:[%s621_s3 + $0x8] sm:$0xff] }
   0x6   :  { %71 = vmatpush.msra.mxu0 %v41_v2  ;;  %142 = vmatpush.msra.mxu2 %v122_v12  ;;  %v119_v15 = vld [vmem:[%s621_s3] sm:$0xff] }
   0x7   :  { %v440_v19 = vld [vmem:[%s619_s2] ss:$0 sm:$0xff] }
   0x8   :  { %72 = vmatpush.msra.mxu0 %v40_v3  ;;  %143 = vmatpush.msra.mxu2 %v121_v13  ;;  %v558_v29 = vld [vmem:[%s622_s5] sm:$0x3] }
   0x9   :  { %v441_v31 = vld [vmem:[%s623_s4] ss:$0 sm:$0xff] }
   0xa   :  { %73 = vmatpush.msra.mxu0 %v39_v4  ;;  %144 = vmatpush.msra.mxu2 %v120_v14  ;;  %v150_v36 = vld [vmem:[%s624_s6] sm:$0x3] }
   0xc   :  { %74 = vmatpush.msra.mxu0 %v38_v5  ;;  %145 = vmatpush.msra.mxu2 %v119_v15 }
   0xe   :  { %75 = vmatpush.msra.mxu0 %v37_v6 }
  0x10   :  { %76 = vmatpush.msra.mxu0 %v36_v7 }
  0x11   :  { %417 = vmatmul.msk.f32.vlgmr.msra.gmra.mxu0 %vm48_vm0, %v32_v8 }
  0x19   :  { %418 = vmatmul.msk.f32.gmra.mxu0 %vm48_vm0, %v33_v9  ;;  %v319_v9 = vld [vmem:[%s625_s7 + $0x18] sm:$0xff] }
  0x21   :  { %419 = vmatmul.msk.f32.gmra.mxu0 %vm48_vm0, %v34_v10  ;;  %v318_v10 = vld [vmem:[%s625_s7 + $0x10] sm:$0xff] }
  0x29   :  { %420 = vmatmul.msk.f32.gmra.mxu0 %vm48_vm0, %v35_v11 }
  0x8e   :  { %v78_v16 = vpop.f32.mrf.mxu0 }
  0x8f   :  { %v79_v25 = vadd.f32 %v440_v19, %v78_v16  ;;  %v343_v16 = vld [vmem:[%s626_s8] sm:$0xff] }
  0x91   :  { %v90_v28 = vmax.f32 %v79_v25, 0.0 }
  0x96   :  { %v81_v17 = vpop.f32.mrf.mxu0 }
  0x97   :  { %v82_v23 = vadd.f32 %v440_v19, %v81_v17  ;;  %v346_v17 = vld [vmem:[%s626_s8 + $0x18] sm:$0xff] }
  0x99   :  { %v91_v27 = vmax.f32 %v82_v23, 0.0 }
  0x9e   :  { %v84_v18 = vpop.f32.mrf.mxu0 }
  0x9f   :  { %v85_v21 = vadd.f32 %v440_v19, %v84_v18 }
  0xa1   :  { %v92_v26 = vmax.f32 %v85_v21, 0.0  ;;  %v344_v21 = vld [vmem:[%s626_s8 + $0x8] sm:$0xff] }
  0xa6   :  { %v87_v20 = vpop.f32.mrf.mxu0 }
  0xa7   :  { %v88_v22 = vadd.f32 %v440_v19, %v87_v20 }
  0xa9   :  { %v93_v24 = vmax.f32 %v88_v22, 0.0 }
  0xab   :  { %111 = vmatpush.msra.mxu1 %v93_v24  ;;  %432 = vmatpush.xpose.msk.msrb.mxu2 %vm95_vm1, %v93_v24 }
  0xad   :  { %112 = vmatpush.msra.mxu1 %v92_v26 }
  0xaf   :  { %113 = vmatpush.msra.mxu1 %v91_v27  ;;  %433 = vmatpush.xpose.msk.msrb.mxu2 %vm95_vm1, %v92_v26 }
  0xb1   :  { %114 = vmatpush.msra.mxu1 %v90_v28 }
  0xb2   :  { %421 = vmatmul.msk.f32.vlgmr.msra.gmra.mxu1 %vm95_vm1, %v558_v29 }
  0xb3   :  { %434 = vmatpush.xpose.msk.msrb.mxu2 %vm95_vm1, %v91_v27  ;;  %427 = vmatpush.xpose.msk.msrb.mxu1 %vm156_vm2, %v122_v12 }
  0xb7   :  { %435 = vmatpush.xpose.msk.msrb.mxu2 %vm95_vm1, %v90_v28  ;;  %428 = vmatpush.xpose.msk.msrb.mxu1 %vm156_vm2, %v121_v13  ;;  %v317_v13 = vld [vmem:[%s625_s7 + $0x8] sm:$0xff] }
  0xbb   :  { %429 = vmatpush.xpose.msk.msrb.mxu1 %vm156_vm2, %v120_v14  ;;  %v316_v14 = vld [vmem:[%s625_s7] sm:$0xff] }
  0xbf   :  { %430 = vmatpush.xpose.msk.msrb.mxu1 %vm156_vm2, %v119_v15  ;;  %v345_v15 = vld [vmem:[%s626_s8 + $0x10] sm:$0xff] }
  0xc3   :  { %384 = vmatpush.msra.mxu1 %v346_v17 }
  0xc5   :  { %385 = vmatpush.msra.mxu1 %v344_v21 }
 0x12f   :  { %v116_v30 = vpop.f32.mrf.mxu1 }
 0x130   :  { %422 = vmatmul.msk.f32.vlgmr.msra.gmra.mxu2 %vm95_vm1, %v116_v30 }
 0x1b3   :  { %v147_v32 = vpop.f32.mrf.mxu2 }
 0x1b4   :  { %v148_v33 = vadd.f32 %v441_v31, %v147_v32 }
 0x1b6   :  { %423 = vmatpush.xpose.msk.msra.mxu3 %vm156_vm2, %v148_v33  ;;  %v151_v34 = vmul.f32 %v148_v33, %v148_v33 }
 0x1b8   :  { %v153_v35 = vsel %vm152_vm4, %v151_v34, 0.0 }
 0x1b9   :  { %424 = vmatmul.msk.f32.vlgmr.msra.gmra.mxu3 %vm156_vm2, %v148_v33  ;;  %154 = vadd.xlane.f32.xlu1 %v153_v35 }
 0x1ba   :  { %425 = vmatpush.msk.msrb.mxu3 %vm181_vm3, %v148_v33 }
 0x1bc   :  { %335 = vmatpush.msra.mxu3 %v319_v9 }
 0x1be   :  { %336 = vmatpush.msra.mxu3 %v318_v10 }
 0x1c0   :  { %337 = vmatpush.msra.mxu3 %v317_v13 }
 0x1c2   :  { %338 = vmatpush.msra.mxu3 %v316_v14 }
 0x22c   :  { %v155_v49 = vpop.xlane.xlu1 %154 }
 0x22d   :  { %v182_v50 = vsel %vm181_vm3, %v155_v49, -inf }
 0x22e   :  { %v183_v51 = vrot.slane %v182_v50, 4 }
 0x230   :  { %v184_v52 = vmax.f32 %v182_v50, %v183_v51 }
 0x232   :  { %v185_v53 = vrot.slane %v184_v52, 2 }
 0x234   :  { %v186_v54 = vmax.f32 %v184_v52, %v185_v53 }
 0x236   :  { %v187_v55 = vrot.slane %v186_v54, 1 }
 0x238   :  { %v188_v56 = vmax.f32 %v186_v54, %v187_v55 }
 0x23a   :  { %v193_v57 = vsub.f32 %v155_v49, %v188_v56 }
 0x23c   :  { %v177_v37 = vpop.f32.mrf.mxu3  ;;  %v194_v58 = vmul.f32 1.442695, %v193_v57 }
 0x23d   :  { %v180_v38 = vmul.f32 %v177_v37, %v150_v36 }
 0x23f   :  { %v190_v39 = vsel %vm189_vm5, %v180_v38, -inf }
 0x240   :  { %191 = vmax.xlane.f32.xlu0 %v190_v39 }
 0x2b3   :  { %v192_v40 = vpop.xlane.xlu0 %191 }
 0x2b4   :  { %v196_v41 = vsub.f32 %v180_v38, %v192_v40 }
 0x2b6   :  { %v197_v42 = vmul.f32 1.442695, %v196_v41 }
 0x2b8   :  { %442 = vpow2.f32 %v197_v42 }
 0x2be   :  { %v443_v43 = vpop.eup %442 }
 0x2bf   :  { %v207_v44 = vsel %vm189_vm5, %v443_v43, 0.0  ;;  %v213_v46 = vmul.f32 %v443_v43, %v150_v36 }
 0x2c0   :  { %208 = vadd.xlane.f32.xlu0 %v207_v44 }
 0x333   :  { %v209_v45 = vpop.xlane.xlu0 %208 }
 0x334   :  { %444 = vrcp.f32 %v209_v45 }
 0x335   :  { %446 = vpow2.f32 %v194_v58 }
 0x33a   :  { %v445_v47 = vpop.eup %444 }
 0x33b   :  { %v214_v48 = vmul.f32 %v445_v47, %v213_v46  ;;  %v447_v59 = vpop.eup %446 }
 0x33c   :  { %v199_v60 = vsel %vm181_vm3, %v447_v59, 0.0  ;;  %v211_v4 = vmul.f32 2.0, %v447_v59 }
 0x33d   :  { %426 = vmatmul.msk.f32.vlgmr.msrb.gmra.mxu3 %vm216_vm6, %v214_v48  ;;  %v200_v61 = vrot.slane %v199_v60, 4 }
 0x33e   :  { %364 = vmatpush.msrb.mxu3 %v345_v15 }
 0x33f   :  { %v201_v62 = vadd.f32 %v200_v61, %v199_v60 }
 0x340   :  { %365 = vmatpush.msrb.mxu3 %v343_v16 }
 0x341   :  { %v202_v63 = vrot.slane %v201_v62, 2 }
 0x343   :  { %v203_v0 = vadd.f32 %v202_v63, %v201_v62 }
 0x345   :  { %v204_v1 = vrot.slane %v203_v0, 1 }
 0x347   :  { %v205_v2 = vadd.f32 %v204_v1, %v203_v0 }
 0x349   :  { %448 = vrcp.f32 %v205_v2 }
 0x34f   :  { %v449_v3 = vpop.eup %448 }
 0x350   :  { %v212_v5 = vmul.f32 %v449_v3, %v211_v4 }
 0x352   :  { %v215_v6 = vmul.f32 %v212_v5, %v148_v33 }
 0x3c0   :  { %v239_v7 = vpop.f32.mrf.mxu3 }
 0x3c1   :  { %v242_v8 = vsub.f32 %v215_v6, %v239_v7 }
 0x3c3   :  { %431 = vmatmul.msk.f32.vlgmr.msrb.gmra.mxu1 %vm156_vm2, %v242_v8 }
 0x440   :  { %v275_v11 = vpop.f32.mrf.mxu1 }
 0x441   :  { %v278_v12 = vmax.f32 %v275_v11, 0.0 }
 0x443   :  { %436 = vmatmul.msk.f32.vlgmr.msrb.gmra.mxu2 %vm95_vm1, %v278_v12 }
 0x4c6   :  { %v311_v18 = vpop.f32.mrf.mxu2 }
 0x4c7   :  { %v314_v19 = vmax.f32 %v311_v18, 0.0 }
 0x4c9   :  { %v315_v20 = vmul.f32 %v314_v19, %v558_v29 }
 0x4cb   :  { %437 = vmatmul.msk.f32.vlgmr.msra.gmra.mxu3 %vm95_vm1, %v315_v20 }
 0x54e   :  { %v340_v22 = vpop.f32.mrf.mxu3 }
 0x54f   :  { %438 = vmatmul.msk.f32.vlgmr.msrb.gmra.mxu3 %vm156_vm2, %v340_v22  ;;  %439 = vmatmul.msk.f32.vlgmr.msra.gmra.mxu1 %vm156_vm2, %v340_v22 }
 0x5cc   :  { %v387_v23 = vpop.f32.mrf.mxu1 }
 0x5cd   :  { %v391_v25 = vsel %vm181_vm3, %v387_v23, inf  ;;  %v396_v28 = vsel %vm181_vm3, %v387_v23, -inf }
 0x5d2   :  { %v367_v24 = vpop.f32.mrf.mxu3 }
 0x5d3   :  { %v390_v26 = vsel %vm181_vm3, %v367_v24, inf  ;;  %v395_v27 = vsel %vm181_vm3, %v367_v24, -inf }
 0x5d4   :  { %v397_v29 = vmax.f32 %v395_v27, %v396_v28  ;;  %v392_v30 = vmin.f32 %v390_v26, %v391_v25 }
 0x5d6   :  { %398 = vmax.xlane.f32.xlu2 %v397_v29  ;;  %393 = vmin.xlane.f32.xlu1 %v392_v30 }
 0x649   :  { %v399_v31 = vpop.xlane.xlu2 %398  ;;  %v394_v32 = vpop.xlane.xlu1 %393 }
 0x64a   :  { %v402_v33 = vsub.f32 %v399_v31, %v394_v32  ;;  %v401_v35 = vsub.f32 %v387_v23, %v394_v32  ;;  %v400_v37 = vsub.f32 %v367_v24, %v394_v32 }
 0x64c   :  { %v403_v34 = vadd.f32 1e-20, %v402_v33 }
 0x64e   :  { %450 = vrcp.f32 %v403_v34 }
 0x654   :  { %v451_v36 = vpop.eup %450 }
 0x655   :  { %v406_v38 = vmul.f32 %v451_v36, %v401_v35  ;;  %v405_v39 = vmul.f32 %v451_v36, %v400_v37 }
 0x657   :  { %v409_v40 = vrot.slane %v406_v38, 6 }
 0x659   :  { %v410_v41 = vsel %vm181_vm3, %v405_v39, %v409_v40 }
 0x65a   :  { %412 = vst [vmem:[%s627_s9] sm:$0xf] %v410_v41 }

</bundles_post_ra>
